<compile_context>
chip_gen: v7x
topology: tpu7x:2x2x1
jax: 0.10.0
libtpu: 0.0.40
codegen_flags: <defaults>
</compile_context>

<pallas_src>
import jax
import jax.numpy as jnp
from jax.experimental import pallas as pl
from jax.experimental.pallas import tpu as pltpu


def _linear_kernel(x_ref, w_ref, b_ref, o_ref, acc_ref):
    # x_ref: (tm, tk) bf16 block of flattened input
    # w_ref: (tk, tn) bf16 block of W^T (canonical RHS layout, no in-loop xpose)
    # b_ref: (1, tn)  f32 bias block
    # o_ref: (tm, tn) output block
    # acc_ref: (tm, tn) f32 VMEM accumulator (persists across the K axis)
    k = pl.program_id(2)

    @pl.when(k == 0)
    def _():
        acc_ref[...] = jnp.zeros_like(acc_ref)

    acc_ref[...] += jnp.dot(x_ref[...], w_ref[...],
                            preferred_element_type=jnp.float32)

    @pl.when(k == pl.num_programs(2) - 1)
    def _():
        o_ref[...] = (acc_ref[...] + b_ref[...]).astype(o_ref.dtype)


def _round_up(v, m):
    return ((v + m - 1) // m) * m


def _pick_tile(dim, cap, align):
    """Return (tile, padded_dim).

    Prefer a single full-dim block (no padding; legal even if dim is not a
    multiple of `align`); otherwise an `align`-multiple tile that divides
    `dim` exactly (no padding); otherwise the capped tile + zero padding.
    """
    if dim <= cap:
        return dim, dim
    t = (cap // align) * align
    while t >= align:
        if dim % t == 0:
            return t, dim
        t -= align
    t = (cap // align) * align
    return t, _round_up(dim, t)


def classifier_forward(x, weight, bias, *, compute_dtype=jnp.bfloat16,
                       tm_cap=512, tn_cap=512, tk_cap=2048):
    """Flatten(x) @ weight.T + bias (weight is the PyTorch (outp, inp) layout)."""
    n = x.shape[0]
    x_flat = x.reshape(n, -1)                 # nn.Flatten (row-major, == torch)
    inp = x_flat.shape[1]
    outp = weight.shape[0]
    out_dtype = x.dtype

    # ---- tile / padding selection ------------------------------------------
    tm, m_pad = _pick_tile(n, tm_cap, 8)      # grid_m == 1 for batch <= tm_cap
    tn, n_pad = _pick_tile(outp, tn_cap, 128)
    tk, k_pad = _pick_tile(inp, tk_cap, 128)

    # v7x megacore: expose >=2 blocks on a parallel axis when cheaply possible
    # (prefer splitting N: re-reads the small x, not the dominant weight).
    if m_pad // tm == 1 and n_pad // tn == 1:
        if n_pad % 256 == 0:
            tn = n_pad // 2
        elif m_pad % 16 == 0:
            tm = m_pad // 2

    # ---- boundary casts (transpose folded into the bf16-cast copy) ---------
    x_c = x_flat.astype(compute_dtype)
    w_t = weight.T.astype(compute_dtype)      # (inp, outp) canonical RHS
    b_2d = bias.reshape(1, outp).astype(jnp.float32)

    x_p = x_c if (m_pad, k_pad) == x_c.shape else jnp.pad(
        x_c, ((0, m_pad - n), (0, k_pad - inp)))
    w_p = w_t if (k_pad, n_pad) == w_t.shape else jnp.pad(
        w_t, ((0, k_pad - inp), (0, n_pad - outp)))
    b_p = b_2d if n_pad == outp else jnp.pad(b_2d, ((0, 0), (0, n_pad - outp)))

    grid = (m_pad // tm, n_pad // tn, k_pad // tk)
    grid_m, grid_n, _ = grid

    in_bytes = jnp.dtype(compute_dtype).itemsize
    cost = pl.CostEstimate(
        flops=2 * m_pad * k_pad * n_pad,
        transcendentals=0,
        bytes_accessed=(grid_n * x_p.size * in_bytes      # x re-read per N tile
                        + grid_m * w_p.size * in_bytes    # W re-read per M tile
                        + b_p.size * 4
                        + m_pad * n_pad * jnp.dtype(out_dtype).itemsize),
    )

    out_padded = pl.pallas_call(
        _linear_kernel,
        out_shape=jax.ShapeDtypeStruct((m_pad, n_pad), out_dtype),
        grid_spec=pltpu.PrefetchScalarGridSpec(
            num_scalar_prefetch=0,
            grid=grid,
            in_specs=[
                pl.BlockSpec((tm, tk), lambda i, j, k: (i, k)),   # x tiles
                # TODO(synk): add pipeline_mode=pl.Buffered(3) here if a
                # profile shows exposed weight DMA between K steps.
                pl.BlockSpec((tk, tn), lambda i, j, k: (k, j)),   # W^T tiles
                pl.BlockSpec((1, tn), lambda i, j, k: (0, j)),    # bias tiles
            ],
            out_specs=pl.BlockSpec((tm, tn), lambda i, j, k: (i, j)),
            scratch_shapes=[pltpu.VMEM((tm, tn), jnp.float32)],
        ),
        compiler_params=pltpu.CompilerParams(
            dimension_semantics=("parallel", "parallel", "arbitrary"),
            vmem_limit_bytes=48 * 1024 * 1024,
        ),
        cost_estimate=cost,
    )(x_p, w_p, b_p)

    if (m_pad, n_pad) != (n, outp):
        out_padded = out_padded[:n, :outp]
    return out_padded


if __name__ == "__main__":
    key = jax.random.PRNGKey(0)
    k_x, k_w, k_b = jax.random.split(key, 3)

    # Small shapes consistent with the module: batch=2, channels=4, spatial=16
    N, C, H, W = 2, 4, 16, 16
    inp = C * H * W          # 1024
    outp = 32

    x = jax.random.normal(k_x, (N, C, H, W), dtype=jnp.float32)
    # Deterministic init (mimicking nn.Linear uniform init scale)
    bound = 1.0 / (inp ** 0.5)
    weight = jax.random.uniform(k_w, (outp, inp), jnp.float32, -bound, bound)
    bias = jax.random.uniform(k_b, (outp,), jnp.float32, -bound, bound)

    out = classifier_forward(x, weight, bias)
    jax.block_until_ready(out)
    assert out.shape == (N, outp)

    # Reference 1: identical bf16 input/weight rounding, f32 accumulation.
    xb = x.reshape(N, -1).astype(jnp.bfloat16).astype(jnp.float32)
    wb = weight.astype(jnp.bfloat16).astype(jnp.float32)
    ref_bf16 = xb @ wb.T + bias
    assert jnp.allclose(out, ref_bf16, atol=2e-3, rtol=2e-3), \
        "mismatch vs bf16-rounded reference"

    # Reference 2: full f32 reference (loose tolerance for the bf16 boundary cast).
    ref_f32 = x.reshape(N, -1) @ weight.T + bias
    assert jnp.allclose(out, ref_f32, atol=5e-2, rtol=5e-2), \
        "mismatch vs f32 reference"

    print("KERNEL_OK")
</pallas_src>

<mosaic_0001>
module attributes {stable_mosaic.version = 11 : i64} {
  func.func @_linear_kernel(%arg0: i32, %arg1: i32, %arg2: i32, %arg3: memref<2x1024xbf16, #tpu.memory_space<vmem>>, %arg4: memref<1024x32xbf16, #tpu.memory_space<vmem>>, %arg5: memref<1x32xf32, #tpu.memory_space<vmem>>, %arg6: memref<2x32xf32, #tpu.memory_space<vmem>>, %arg7: memref<2x32xf32, #tpu.memory_space<vmem>>) attributes {dimension_semantics = [#tpu.dimension_semantics<parallel>, #tpu.dimension_semantics<parallel>, #tpu.dimension_semantics<arbitrary>], iteration_bounds = array<i64: 1, 1, 1>, scalar_prefetch = 0 : i64, scratch_operands = 1 : i64, tpu.core_type = #tpu.core_type<tc>, window_params = [{transform_indices = @transform_0, window_bounds = array<i64: 2, 1024>}, {transform_indices = @transform_1, window_bounds = array<i64: 1024, 32>}, {transform_indices = @transform_2, window_bounds = array<i64: 1, 32>}, {transform_indices = @transform_3, window_bounds = array<i64: 2, 32>}]} {
    %c0_i32 = arith.constant 0 : i32
    %0 = arith.cmpi eq, %arg2, %c0_i32 : i32
    %1 = arith.extui %0 : i1 to i32
    %c0_i32_0 = arith.constant 0 : i32
    %2 = arith.cmpi ne, %1, %c0_i32_0 : i32
    scf.if %2 {
      %cst_10 = arith.constant 0.000000e+00 : f32
      %12 = vector.broadcast %cst_10 : f32 to vector<2x32xf32>
      %c0_11 = arith.constant 0 : index
      %c0_12 = arith.constant 0 : index
      %13 = vector.load %arg7[%c0_11, %c0_12] : memref<2x32xf32, #tpu.memory_space<vmem>>, vector<2x32xf32>
      tpu.vector_store %arg7[%c0_11, %c0_12], %12 {strides = array<i32>} : memref<2x32xf32, #tpu.memory_space<vmem>>, vector<2x32xf32>,
    } else {
    }
    %c0 = arith.constant 0 : index
    %c0_1 = arith.constant 0 : index
    %3 = vector.load %arg7[%c0, %c0_1] : memref<2x32xf32, #tpu.memory_space<vmem>>, vector<2x32xf32>
    %c0_2 = arith.constant 0 : index
    %c0_3 = arith.constant 0 : index
    %4 = vector.load %arg3[%c0_2, %c0_3] : memref<2x1024xbf16, #tpu.memory_space<vmem>>, vector<2x1024xbf16>
    %c0_4 = arith.constant 0 : index
    %c0_5 = arith.constant 0 : index
    %5 = vector.load %arg4[%c0_4, %c0_5] : memref<1024x32xbf16, #tpu.memory_space<vmem>>, vector<1024x32xbf16>
    %cst = arith.constant dense<0.000000e+00> : vector<2x32xf32>
    %6 = tpu.matmul %4, %5, %cst {dimension_numbers = #tpu.dot_dimension_numbers<[1], [0], [0], [1], [0, 0, 1, 1], [], []>} : vector<2x1024xbf16>, vector<1024x32xbf16>, vector<2x32xf32> -> vector<2x32xf32>
    %7 = arith.addf %3, %6 : vector<2x32xf32>
    %c0_6 = arith.constant 0 : index
    %c0_7 = arith.constant 0 : index
    %8 = vector.load %arg7[%c0_6, %c0_7] : memref<2x32xf32, #tpu.memory_space<vmem>>, vector<2x32xf32>
    tpu.vector_store %arg7[%c0_6, %c0_7], %7 {strides = array<i32>} : memref<2x32xf32, #tpu.memory_space<vmem>>, vector<2x32xf32>,
    %c0_i32_8 = arith.constant 0 : i32
    %9 = arith.cmpi eq, %arg2, %c0_i32_8 : i32
    %10 = arith.extui %9 : i1 to i32
    %c0_i32_9 = arith.constant 0 : i32
    %11 = arith.cmpi ne, %10, %c0_i32_9 : i32
    scf.if %11 {
      %c0_10 = arith.constant 0 : index
      %c0_11 = arith.constant 0 : index
      %12 = vector.load %arg7[%c0_10, %c0_11] : memref<2x32xf32, #tpu.memory_space<vmem>>, vector<2x32xf32>
      %c0_12 = arith.constant 0 : index
      %c0_13 = arith.constant 0 : index
      %13 = vector.load %arg5[%c0_12, %c0_13] : memref<1x32xf32, #tpu.memory_space<vmem>>, vector<1x32xf32>
      %14 = vector.broadcast %13 : vector<1x32xf32> to vector<2x32xf32>
      %15 = arith.addf %12, %14 : vector<2x32xf32>
      %c0_14 = arith.constant 0 : index
      %c0_15 = arith.constant 0 : index
      %16 = vector.load %arg6[%c0_14, %c0_15] : memref<2x32xf32, #tpu.memory_space<vmem>>, vector<2x32xf32>
      tpu.vector_store %arg6[%c0_14, %c0_15], %15 {strides = array<i32>} : memref<2x32xf32, #tpu.memory_space<vmem>>, vector<2x32xf32>,
    } else {
    }
    return
  }
  func.func @transform_0(%arg0: i32, %arg1: i32, %arg2: i32) -> (i32, i32) {
    %c0_i32 = arith.constant 0 : i32
    return %arg0, %arg2 : i32, i32
  }
  func.func @transform_1(%arg0: i32, %arg1: i32, %arg2: i32) -> (i32, i32) {
    %c0_i32 = arith.constant 0 : i32
    return %arg2, %arg1 : i32, i32
  }
  func.func @transform_2(%arg0: i32, %arg1: i32, %arg2: i32) -> (i32, i32) {
    %c0_i32 = arith.constant 0 : i32
    %c0_i32_0 = arith.constant 0 : i32
    return %c0_i32, %arg1 : i32, i32
  }
  func.func @transform_3(%arg0: i32, %arg1: i32, %arg2: i32) -> (i32, i32) {
    %c0_i32 = arith.constant 0 : i32
    return %arg0, %arg1 : i32, i32
  }
}

</mosaic_0001>

<bundles_post_ra>
// kernel: tpu_custom_call.1
= control target key start
LH: loop header
LB: loop body
LE: loop exit
PB: predicated region body
PF: predicated region fallthrough
CT: control target
= control target key end

     0   :  { %v157_v28 = vlaneseq  ;;  %v1029_v36 = vmov 1966171168   ;;  %s1278_s0 = inlined_call_operand.vmem [shape: bf16[2,1024], index: 0, kind: input, shape index: {}]   ;;  %s1279_s1 = inlined_call_operand.vmem [shape: bf16[1024,32], index: 1, kind: input, shape index: {}]   ;;  %s1280_s2 = inlined_call_operand.vmem [shape: f32[1,32], index: 2, kind: input, shape index: {}]   ;;  %s1281_s3 = inlined_call_operand.hbm [shape: f32[2,32], index: 3, kind: output, shape index: {}]  }
   0x1   :  { %v940_v0 = vld [vmem:[%s1279_s1 + $0x40] sm:$0xff]   ;;  %v944_v4 = vld [vmem:[%s1279_s1 + $0x48] sm:$0xff]   ;;  %v948_v8 = vld [vmem:[%s1279_s1 + $0x50] sm:$0xff]   ;;  %v155_v37 = vunpack.c.l.s4 %v1029_v36 }
   0x2   :  { %v941_v1 = vld [vmem:[%s1279_s1 + $0xc0] sm:$0xff]   ;;  %849 = vmatprep.subr.bf16.mxu0 %v940_v0  ;;  %v945_v5 = vld [vmem:[%s1279_s1 + $0xc8] sm:$0xff]   ;;  %v949_v9 = vld [vmem:[%s1279_s1 + $0xd0] sm:$0xff]   ;;  %v158_v33 = vshrl.u32 %v157_v28, 7 }
   0x3   :  { %v942_v2 = vld [vmem:[%s1279_s1] sm:$0xff]   ;;  %871 = vmatprep.subr.bf16.mxu1 %v941_v1  ;;  %v946_v6 = vld [vmem:[%s1279_s1 + $0x8] sm:$0xff]   ;;  %v950_v10 = vld [vmem:[%s1279_s1 + $0x10] sm:$0xff]   ;;  %v156_v40 = vunpack.c.0.s8 %v155_v37 }
   0x4   :  { %v943_v3 = vld [vmem:[%s1279_s1 + $0x80] sm:$0xff]   ;;  %850 = vmatpush3.bf16.msra.mxu0 %v942_v2  ;;  %v947_v7 = vld [vmem:[%s1279_s1 + $0x88] sm:$0xff]   ;;  %v951_v11 = vld [vmem:[%s1279_s1 + $0x90] sm:$0xff]  }
   0x5   :  { %872 = vmatpush3.bf16.msra.mxu1 %v943_v3  ;;  %851 = vmatprep.subr.bf16.mxu0 %v944_v4  ;;  %v952_v12 = vld [vmem:[%s1279_s1 + $0x58] sm:$0xff]   ;;  %v956_v16 = vld [vmem:[%s1279_s1 + $0x60] sm:$0xff]   ;;  %v960_v20 = vld [vmem:[%s1279_s1 + $0x68] sm:$0xff]   ;;  %v1157_v41 = vsub.s32 %v156_v40, %v158_v33 }
   0x6   :  { %873 = vmatprep.subr.bf16.mxu1 %v945_v5  ;;  %v953_v13 = vld [vmem:[%s1279_s1 + $0xd8] sm:$0xff]   ;;  %v957_v17 = vld [vmem:[%s1279_s1 + $0xe0] sm:$0xff]   ;;  %v961_v21 = vld [vmem:[%s1279_s1 + $0xe8] sm:$0xff]  }
   0x7   :  { %v954_v14 = vld [vmem:[%s1279_s1 + $0x18] sm:$0xff]   ;;  %v958_v18 = vld [vmem:[%s1279_s1 + $0x20] sm:$0xff]   ;;  %v962_v22 = vld [vmem:[%s1279_s1 + $0x28] sm:$0xff]  }
   0x8   :  { %852 = vmatpush3.bf16.msra.mxu0 %v946_v6  ;;  %v955_v15 = vld [vmem:[%s1279_s1 + $0x98] sm:$0xff]   ;;  %v959_v19 = vld [vmem:[%s1279_s1 + $0xa0] sm:$0xff]   ;;  %v963_v23 = vld [vmem:[%s1279_s1 + $0xa8] sm:$0xff]  }
   0x9   :  { %874 = vmatpush3.bf16.msra.mxu1 %v947_v7  ;;  %853 = vmatprep.subr.bf16.mxu0 %v948_v8  ;;  %v964_v24 = vld [vmem:[%s1279_s1 + $0x70] sm:$0xff]   ;;  %v968_v29 = vld [vmem:[%s1279_s1 + $0x78] sm:$0xff]   ;;  %v23_v34 = vld [vmem:[%s1278_s0] sm:$0xff] }
   0xa   :  { %875 = vmatprep.subr.bf16.mxu1 %v949_v9  ;;  %v965_v25 = vld [vmem:[%s1279_s1 + $0xf0] sm:$0xff]   ;;  %v969_v30 = vld [vmem:[%s1279_s1 + $0xf8] sm:$0xff]   ;;  %v973_v35 = vld [vmem:[%s1279_s1 + $0x140] sm:$0xff]   ;;  %v153_v39 = vcombine.high %v23_v34, %v23_v34  ;;  %v160_v42 = vrot.slane %v23_v34, %v1157_v41 }
   0xb   :  { %v966_v26 = vld [vmem:[%s1279_s1 + $0x30] sm:$0xff]   ;;  %v970_v31 = vld [vmem:[%s1279_s1 + $0x38] sm:$0xff]   ;;  %v974_v38 = vld [vmem:[%s1279_s1 + $0x1c0] sm:$0xff]  }
   0xc   :  { %854 = vmatpush3.bf16.msra.mxu0 %v950_v10  ;;  %v967_v27 = vld [vmem:[%s1279_s1 + $0xb0] sm:$0xff]   ;;  %v971_v32 = vld [vmem:[%s1279_s1 + $0xb8] sm:$0xff]   ;;  %v1161_v43 = vrot.slane %v153_v39, %v1157_v41  ;;  %v168_v44 = vcombine.high %v160_v42, %v160_v42  ;;  %v176_v45 = vrot.slane %v160_v42, %v1157_v41  ;;  %v975_v48 = vld [vmem:[%s1279_s1 + $0x100] sm:$0xff]  }
   0xd   :  { %876 = vmatpush3.bf16.msra.mxu1 %v951_v11  ;;  %855 = vmatprep.subr.bf16.mxu0 %v952_v12  ;;  %v977_v51 = vld [vmem:[%s1279_s1 + $0x148] sm:$0xff]   ;;  %v976_v53 = vld [vmem:[%s1279_s1 + $0x180] sm:$0xff]   ;;  %v981_v57 = vld [vmem:[%s1279_s1 + $0x150] sm:$0xff]  }
   0xe   :  { %877 = vmatprep.subr.bf16.mxu1 %v953_v13  ;;  %v169_v46 = vcombine.high %v1161_v43, %v1161_v43  ;;  %v190_v47 = vrot.slane %v168_v44, %v1157_v41  ;;  %v198_v50 = vcombine.high %v176_v45, %v176_v45  ;;  %v978_v54 = vld [vmem:[%s1279_s1 + $0x1c8] sm:$0xff]   ;;  %v982_v59 = vld [vmem:[%s1279_s1 + $0x1d0] sm:$0xff]   ;;  %v985_v61 = vld [vmem:[%s1279_s1 + $0x158] sm:$0xff]  }
   0xf   :  { %v979_v56 = vld [vmem:[%s1279_s1 + $0x108] sm:$0xff]   ;;  %v983_v60 = vld [vmem:[%s1279_s1 + $0x110] sm:$0xff]   ;;  %v986_v63 = vld [vmem:[%s1279_s1 + $0x1d8] sm:$0xff]  }
  0x10   :  { %856 = vmatpush3.bf16.msra.mxu0 %v954_v14  ;;  %v197_v49 = vrot.slane %v169_v46, %v1157_v41  ;;  %626 = vmatprep.mubr.bf16.mxu0 %v190_v47  ;;  %v200_v52 = vcombine.high %v190_v47, %v190_v47  ;;  %v980_v58 = vld [vmem:[%s1279_s1 + $0x188] sm:$0xff]   ;;  %v984_v62 = vld [vmem:[%s1279_s1 + $0x190] sm:$0xff]   ;;  %v987_v0 = vld [vmem:[%s1279_s1 + $0x118] sm:$0xff]  }
  0x11   :  { %878 = vmatpush3.bf16.msra.mxu1 %v955_v15  ;;  %857 = vmatprep.subr.bf16.mxu0 %v956_v16  ;;  %v989_v1 = vld [vmem:[%s1279_s1 + $0x160] sm:$0xff]   ;;  %v988_v2 = vld [vmem:[%s1279_s1 + $0x198] sm:$0xff]   ;;  %v993_v5 = vld [vmem:[%s1279_s1 + $0x168] sm:$0xff]  }
  0x12   :  { %879 = vmatprep.subr.bf16.mxu1 %v957_v17  ;;  %v201_v55 = vcombine.high %v197_v49, %v197_v49  ;;  %666 = vmatprep.mubr.bf16.mxu1 %v200_v52  ;;  %v990_v3 = vld [vmem:[%s1279_s1 + $0x1e0] sm:$0xff]   ;;  %v994_v7 = vld [vmem:[%s1279_s1 + $0x1e8] sm:$0xff]   ;;  %v997_v9 = vld [vmem:[%s1279_s1 + $0x170] sm:$0xff]  }
  0x13   :  { %v991_v4 = vld [vmem:[%s1279_s1 + $0x120] sm:$0xff]   ;;  %v995_v8 = vld [vmem:[%s1279_s1 + $0x128] sm:$0xff]  }
  0x14   :  { %858 = vmatpush3.bf16.msra.mxu0 %v958_v18  ;;  %v992_v6 = vld [vmem:[%s1279_s1 + $0x1a0] sm:$0xff]  }
  0x15   :  { %880 = vmatpush3.bf16.msra.mxu1 %v959_v19  ;;  %859 = vmatprep.subr.bf16.mxu0 %v960_v20 }
  0x16   :  { %881 = vmatprep.subr.bf16.mxu1 %v961_v21 }
  0x18   :  { %860 = vmatpush3.bf16.msra.mxu0 %v962_v22 }
  0x19   :  { %882 = vmatpush3.bf16.msra.mxu1 %v963_v23  ;;  %861 = vmatprep.subr.bf16.mxu0 %v964_v24 }
  0x1a   :  { %883 = vmatprep.subr.bf16.mxu1 %v965_v25 }
  0x1c   :  { %862 = vmatpush3.bf16.msra.mxu0 %v966_v26 }
  0x1d   :  { %884 = vmatpush3.bf16.msra.mxu1 %v967_v27  ;;  %863 = vmatprep.subr.bf16.mxu0 %v968_v29 }
  0x1e   :  { %885 = vmatprep.subr.bf16.mxu1 %v969_v30 }
  0x20   :  { %864 = vmatpush3.bf16.msra.mxu0 %v970_v31 }
  0x21   :  { %886 = vmatpush3.bf16.msra.mxu1 %v971_v32  ;;  %893 = vmatprep.subr.bf16.mxu0 %v973_v35 }
  0x22   :  { %915 = vmatprep.subr.bf16.mxu1 %v974_v38 }
  0x23   :  { %627 = vmatmul.mubr.bf16.vlgmr.msra.gmra.mrb[0].mxu0 %v176_v45 }
  0x24   :  { %894 = vmatpush3.bf16.msra.mxu0 %v975_v48  ;;  %667 = vmatmul.mubr.bf16.vlgmr.msra.gmra.mrb[0].mxu1 %v198_v50 }
  0x25   :  { %895 = vmatprep.subr.bf16.mxu0 %v977_v51  ;;  %916 = vmatpush3.bf16.msra.mxu1 %v976_v53 }
  0x26   :  { %706 = vmatprep.mubr.bf16.mxu0 %v197_v49  ;;  %917 = vmatprep.subr.bf16.mxu1 %v978_v54 }
  0x27   :  { %746 = vmatprep.mubr.bf16.mxu1 %v201_v55 }
  0x28   :  { %896 = vmatpush3.bf16.msra.mxu0 %v979_v56 }
  0x29   :  { %897 = vmatprep.subr.bf16.mxu0 %v981_v57  ;;  %918 = vmatpush3.bf16.msra.mxu1 %v980_v58 }
  0x2a   :  { %919 = vmatprep.subr.bf16.mxu1 %v982_v59 }
  0x2c   :  { %898 = vmatpush3.bf16.msra.mxu0 %v983_v60 }
  0x2d   :  { %899 = vmatprep.subr.bf16.mxu0 %v985_v61  ;;  %920 = vmatpush3.bf16.msra.mxu1 %v984_v62 }
  0x2e   :  { %921 = vmatprep.subr.bf16.mxu1 %v986_v63 }
  0x30   :  { %900 = vmatpush3.bf16.msra.mxu0 %v987_v0 }
  0x31   :  { %901 = vmatprep.subr.bf16.mxu0 %v989_v1  ;;  %922 = vmatpush3.bf16.msra.mxu1 %v988_v2 }
  0x32   :  { %923 = vmatprep.subr.bf16.mxu1 %v990_v3 }
  0x34   :  { %902 = vmatpush3.bf16.msra.mxu0 %v991_v4 }
  0x35   :  { %903 = vmatprep.subr.bf16.mxu0 %v993_v5 }
  0x36   :  { %8 = vsyncpa [#allocation4], 0  ;;  %924 = vmatpush3.bf16.msra.mxu1 %v992_v6  ;;  %v996_v10 = vld [vmem:[%s1279_s1 + $0x1a8] sm:$0xff]   ;;  %v998_v11 = vld [vmem:[%s1279_s1 + $0x1f0] sm:$0xff]   ;;  %v183_v17 = vrot.slane %v1161_v43, %v1157_v41  ;;  %vm20_vm0 = vcmask 254976   ;;  %v1030_v20 = vmov 0.0  }
  0x37   :  { %925 = vmatprep.subr.bf16.mxu1 %v994_v7  ;;  %v999_v12 = vld [vmem:[%s1279_s1 + $0x130] sm:$0xff]   ;;  %v1001_v13 = vld [vmem:[%s1279_s1 + $0x178] sm:$0xff]   ;;  %21 = vst.msk [vmem:[#allocation2] sm:$0x3] %vm20_vm0, %v1030_v20  ;;  %v848_v46 = vld [vmem:[%s1280_s2] ss:$0 sm:$0xff] }
  0x38   :  { %904 = vmatpush3.bf16.msra.mxu0 %v995_v8  ;;  %v1000_v14 = vld [vmem:[%s1279_s1 + $0x1b0] sm:$0xff]   ;;  %v1002_v15 = vld [vmem:[%s1279_s1 + $0x1f8] sm:$0xff]   ;;  %v199_v19 = vcombine.high %v183_v17, %v183_v17  ;;  %s1031_s5 = smov [#allocation3]  }
  0x39   :  { %905 = vmatprep.subr.bf16.mxu0 %v997_v9  ;;  %v1003_v16 = vld [vmem:[%s1279_s1 + $0x138] sm:$0xff]   ;;  %s776_s6 = sshll.u32 %s1031_s5, 4  ;;  %s777_s6 = int_to_ptr.vmem [resolvable:$true] %s776_s6 }
  0x3a   :  { %926 = vmatpush3.bf16.msra.mxu1 %v996_v10  ;;  %v1004_v18 = vld [vmem:[%s1279_s1 + $0x1b8] sm:$0xff]   ;;  %s1005_s7 = scalar_lea.vmem %s777_s6, 32  ;;  %p1010_p1 = scmp.lt.s32.totalorder %s777_s6, %s777_s6 }
  0x3b   :  { %927 = vmatprep.subr.bf16.mxu1 %v998_v11  ;;  %p1006_p0 = scmp.ne.s32.totalorder %s777_s6, %s1005_s7  ;;  %p1011_p2 = scmp.lt.s32.totalorder %s1005_s7, %s1005_s7 }
  0x3c   :  { %906 = vmatpush3.bf16.msra.mxu0 %v999_v12 }
  0x3d   :  { %907 = vmatprep.subr.bf16.mxu0 %v1001_v13  ;;  %p1012_p3 = por %p1011_p2, %p1010_p1 }
  0x3e   :  { %928 = vmatpush3.bf16.msra.mxu1 %v1000_v14  ;;  %v22_v43 = vld [vmem:[#allocation2] sm:$0x3] }
  0x3f   :  { %929 = vmatprep.subr.bf16.mxu1 %v1002_v15  ;;  %p1013_p4 = pnand %p1012_p3, %p1006_p0 }
  0x40   :  { %908 = vmatpush3.bf16.msra.mxu0 %v1003_v16 }
  0x42   :  { %930 = vmatpush3.bf16.msra.mxu1 %v1004_v18 }
  0x43   :  { %707 = vmatmul.mubr.bf16.vlgmr.msra.gmra.mrb[4].mxu0 %v183_v17 }
  0x45   :  { %747 = vmatmul.mubr.bf16.vlgmr.msra.gmra.mrb[4].mxu1 %v199_v19 }
  0xf6   :  { %v865_v21 = vpop.f32.mrb[0].mxu0 }
  0xf7   :  { %v866_v22 = vpop.f32.mrb[1].mxu0  ;;  %v887_v23 = vpop.f32.mrb[0].mxu1 }
  0xf8   :  { %v867_v24 = vadd.f32 %v866_v22, %v865_v21  ;;  %v868_v25 = vpop.f32.mrb[2].mxu0  ;;  %v888_v26 = vpop.f32.mrb[1].mxu1 }
  0xf9   :  { %v869_v27 = vpop.f32.mrb[3].mxu0  ;;  %v889_v28 = vadd.f32 %v888_v26, %v887_v23  ;;  %v890_v29 = vpop.f32.mrb[2].mxu1 }
  0xfa   :  { %v891_v30 = vpop.f32.mrb[3].mxu1 }
  0xfb   :  { %v669_v31 = vadd.f32 %v889_v28, %v867_v24 }
 0x116   :  { %v909_v32 = vpop.f32.mrb[4].mxu0 }
 0x117   :  { %v910_v33 = vpop.f32.mrb[5].mxu0 }
 0x118   :  { %v931_v34 = vpop.f32.mrb[4].mxu1  ;;  %v911_v35 = vadd.f32 %v910_v33, %v909_v32  ;;  %v912_v36 = vpop.f32.mrb[6].mxu0 }
 0x119   :  { %v932_v37 = vpop.f32.mrb[5].mxu1  ;;  %v913_v38 = vpop.f32.mrb[7].mxu0 }
 0x11a   :  { %v709_v39 = vadd.f32 %v911_v35, %v669_v31  ;;  %v933_v40 = vadd.f32 %v932_v37, %v931_v34  ;;  %v934_v41 = vpop.f32.mrb[6].mxu1 }
 0x11b   :  { %v935_v42 = vpop.f32.mrb[7].mxu1 }
 0x11c   :  { %v749_v44 = vadd.f32 %v933_v40, %v709_v39 }
 0x11e   :  { %v754_v45 = vadd.f32 %v749_v44, %v22_v43 }
 0x120   :  { %756 = vst.msk [vmem:[#allocation2] sm:$0x3] %vm20_vm0, %v754_v45 }
 0x127   :  { %v760_v47 = vld [vmem:[#allocation2] sm:$0x3] }
 0x128   :  { %v768_v48 = vadd.f32 %v848_v46, %v760_v47 }
 0x12a   :  { %769 = vst.msk [vmem:[#allocation3] sm:$0x3] %vm20_vm0, %v768_v48 }
 0x12b   :  { %1016 = shalt.err (!%p1013_p4)
}
 0x12c   :  { %s1017_s10 = scalar_lea.hbm %s1281_s3, 32 }
 0x12d   :  { %p1018_p5 = scmp.ne.s32.totalorder %s1281_s3, %s1017_s10  ;;  %p1021_p6 = scmp.lt.u32.totalorder %s1017_s10, %s1281_s3 }
 0x12f   :  { %p1023_p7 = pnand %p1021_p6, %p1018_p5 }
 0x131   :  { %1026 = shalt.err (!%p1023_p7)
}
 0x132   :  { %779 = dma.vmem_to_hbm [thread:$0]  %s777_s6, 32, %s1281_s3, [#allocation4]  }
 0x133   :  { %1027 = dma.done.wait [#allocation4], 32  }
 0x134   :  { %1028 = vsyncadd [#allocation4], 4294967264 }
 0x135   :  { %783 = vsyncpa [#allocation4], 1 }

</bundles_post_ra>
